<compile_context>
chip_gen: v6e
topology: v6e:2x2x1
jax: 0.10.0
libtpu: 0.0.40
codegen_flags: <defaults>
</compile_context>

<pallas_src>
import jax
import jax.numpy as jnp
import numpy as np
from jax.experimental import pallas as pl
from jax.experimental.pallas import tpu as pltpu


def _build_rope_tables(dim, pt_seq_len=16, ft_seq_len=None, theta=10000.0):
    """Replicates VisionRotaryEmbeddingFast.__init__ buffers (freqs_for='lang')."""
    if ft_seq_len is None:
        ft_seq_len = pt_seq_len
    freqs = 1.0 / (theta ** (jnp.arange(0, dim, 2)[: dim // 2].astype(jnp.float32) / dim))
    t = jnp.arange(ft_seq_len, dtype=jnp.float32) / ft_seq_len * pt_seq_len + 1.0
    freqs = jnp.einsum("i,f->if", t, freqs)              # (S, dim//2)
    freqs = jnp.repeat(freqs, 2, axis=-1)                # (S, dim): [f0,f0,f1,f1,...]
    # broadcat((freqs[None,:,:], freqs[:,None,:]), dim=-1) -> (S, S, 2*dim)
    a = jnp.broadcast_to(freqs[None, :, :], (ft_seq_len, ft_seq_len, dim))
    b = jnp.broadcast_to(freqs[:, None, :], (ft_seq_len, ft_seq_len, dim))
    f = jnp.concatenate([a, b], axis=-1)
    D = 2 * dim
    return jnp.cos(f).reshape(-1, D), jnp.sin(f).reshape(-1, D)


def _fold_rotate_half_sign(freqs_sin):
    """Precompute sign/parity-masked sin tables so the kernel needs no iota/select.

    rotate_half(x)[2i]   = -x[2i+1]  -> pairs with sin_even = -sin on even lanes, 0 on odd
    rotate_half(x)[2i+1] =  x[2i]    -> pairs with sin_odd  =  sin on odd lanes,  0 on even
    """
    D = freqs_sin.shape[-1]
    even = (jnp.arange(D) % 2) == 0
    sin_even = jnp.where(even, -freqs_sin, 0.0).astype(freqs_sin.dtype)
    sin_odd = jnp.where(even, 0.0, freqs_sin).astype(freqs_sin.dtype)
    return sin_even, sin_odd


def _rope_kernel(tt_ref, tbl_ref, out_ref):
    x = tt_ref[...]                     # (TB, TN, D)
    last = x.ndim - 1                   # pltpu.roll requires a non-negative axis
    d = x.shape[last]
    # Adjacent-pair swap via two circular lane rotations (XLU slots, free w.r.t. VPU).
    # Wrap-around / fold-boundary lanes only land where the masked sin tables are 0.
    x_next = pltpu.roll(x, shift=d - 1, axis=last)      # x_next[j] = x[j+1] (mod D)
    x_prev = pltpu.roll(x, shift=1, axis=last)          # x_prev[j] = x[j-1] (mod D)
    cos = tbl_ref[0]                    # (TN, D), broadcasts over leading TB axis
    sin_even = tbl_ref[1]
    sin_odd = tbl_ref[2]
    out_ref[...] = x * cos + x_next * sin_even + x_prev * sin_odd


def _choose_tiles(B, N, D, itemsize, target_bytes=2 << 20, min_steps=8):
    """Pick (TB, TN) so one tt block is ~2 MiB, divides (B, N), respects (8,128),
    and the total number of grid steps stays >= ~min_steps when B allows it."""
    rows_target = max(8, target_bytes // max(1, D * itemsize))
    # Token tiling: largest multiple of 8 dividing N that fits the target;
    # fall back to the full axis (always legal for the (8,128) constraint).
    # TODO(synk): no remainder handling for prime-ish large N*D (full-N fallback may
    # exceed scoped VMEM for huge feature grids).
    TN = N
    if N > rows_target:
        start = (rows_target // 8) * 8
        for cand in range(start, 7, -8):
            if N % cand == 0:
                TN = cand
                break
    # Batch tiling only when a whole-N block is still small.  Keep >= min_steps grid
    # steps (when B allows) so megacore has work and the DMA pipeline can overlap.
    TB = 1
    if TN == N and N < rows_target and B > 1:
        fit_cap = max(1, rows_target // N)
        steps_cap = max(1, B // min(min_steps, B))
        max_tb = min(B, fit_cap, steps_cap)
        for cand in range(max_tb, 0, -1):
            if B % cand == 0:
                TB = cand
                break
    return TB, TN


def _vmem_limit_bytes(TB, TN, D, tt_itemsize, tbl_itemsize):
    tt_block = TB * TN * D * tt_itemsize
    tbl_block = 3 * TN * D * tbl_itemsize
    # tt in + out double-buffered, tables double-buffered (mostly revisit-skipped).
    footprint = 2 * 2 * tt_block + 2 * tbl_block
    return int(min(48 << 20, max(32 << 20, footprint + (8 << 20))))


def vision_rotary_embedding_fast(tt, freqs_cos, freqs_sin):
    """out = tt * freqs_cos + rotate_half(tt) * freqs_sin on TPU (single Pallas kernel)."""
    B, N, D = tt.shape
    assert freqs_cos.shape == (N, D) and freqs_sin.shape == (N, D)
    assert D % 2 == 0, "interleaved-pair RoPE layout requires even D"

    # Tiny one-off table prep outside the kernel; in a real model these would be
    # precomputed alongside the registered cos/sin buffers.
    sin_even, sin_odd = _fold_rotate_half_sign(freqs_sin)
    tbl = jnp.stack([freqs_cos, sin_even, sin_odd], axis=0).astype(tt.dtype)  # (3, N, D)

    # Lane-fold: if D < 128, fold pairs of tokens into the lane axis so stores are
    # lane-dense.  Safe because the masked sin tables are exactly 0 on the lanes that
    # would pick up a neighbour token through the circular rolls.
    fold = 1
    while (D * fold) < 128 and (N % (2 * fold)) == 0:
        fold *= 2
    Nx, Dx = N // fold, D * fold
    tt_x = tt.reshape(B, Nx, Dx)
    tbl_x = tbl.reshape(3, Nx, Dx)

    TB, TN = _choose_tiles(B, Nx, Dx, tt.dtype.itemsize)
    grid = (Nx // TN, B // TB)          # batch innermost -> table block index constant
    if grid[0] > 1:
        sem = ("parallel", "arbitrary")   # shard tokens across v7x cores, keep tables resident
    else:
        sem = ("arbitrary", "parallel")   # single token tile: let megacore split the batch

    out = pl.pallas_call(
        _rope_kernel,
        out_shape=jax.ShapeDtypeStruct((B, Nx, Dx), tt.dtype),
        grid_spec=pltpu.PrefetchScalarGridSpec(
            num_scalar_prefetch=0,
            grid=grid,
            in_specs=[
                pl.BlockSpec((TB, TN, Dx), lambda n, b: (b, n, 0)),
                # Table block index only depends on the token axis -> the DMA is
                # skipped on every inner batch step (fetched Nx//TN times total).
                pl.BlockSpec((3, TN, Dx), lambda n, b: (0, n, 0)),
            ],
            out_specs=pl.BlockSpec((TB, TN, Dx), lambda n, b: (b, n, 0)),
        ),
        compiler_params=pltpu.CompilerParams(
            dimension_semantics=sem,
            vmem_limit_bytes=_vmem_limit_bytes(
                TB, TN, Dx, tt.dtype.itemsize, tbl.dtype.itemsize)),
    )(tt_x, tbl_x)
    return out.reshape(B, N, D)


def _rope_ref(tt, cos, sin):
    """Plain-JAX reference mirroring the PyTorch forward exactly."""
    x = tt.reshape(tt.shape[:-1] + (tt.shape[-1] // 2, 2))
    x1, x2 = x[..., 0], x[..., 1]
    rot = jnp.stack((-x2, x1), axis=-1).reshape(tt.shape)
    return tt * cos + rot * sin


if __name__ == "__main__":
    # Small, forward-consistent shapes: dim=64 (rotary half-dim), ft_seq_len=4
    # -> N = 4*4 = 16 tokens, D = 2*dim = 128 rotary features, batch B = 2.
    dim, pt_seq_len, ft_seq_len = 64, 16, 4
    B = 2
    N = ft_seq_len * ft_seq_len
    D = 2 * dim

    freqs_cos, freqs_sin = _build_rope_tables(dim, pt_seq_len, ft_seq_len)
    tt = jax.random.normal(jax.random.PRNGKey(0), (B, N, D), dtype=jnp.float32)

    # f32 path
    out = jax.block_until_ready(vision_rotary_embedding_fast(tt, freqs_cos, freqs_sin))
    ref = _rope_ref(tt, freqs_cos, freqs_sin)
    np.testing.assert_allclose(np.asarray(out), np.asarray(ref), rtol=1e-5, atol=1e-5)

    # bf16 fast path (halves HBM traffic; kernel is bandwidth-bound).
    tt_bf = tt.astype(jnp.bfloat16)
    out_bf = jax.block_until_ready(vision_rotary_embedding_fast(tt_bf, freqs_cos, freqs_sin))
    ref_bf = _rope_ref(tt_bf.astype(jnp.float32),
                       freqs_cos.astype(jnp.bfloat16).astype(jnp.float32),
                       freqs_sin.astype(jnp.bfloat16).astype(jnp.float32))
    np.testing.assert_allclose(np.asarray(out_bf, dtype=np.float32), np.asarray(ref_bf),
                               rtol=5e-2, atol=1e-1)

    # D < 128 path: dim=32 -> D=64, exercises the lane-fold (token pairs folded into lanes).
    dim2 = 32
    D2 = 2 * dim2
    cos2, sin2 = _build_rope_tables(dim2, pt_seq_len, ft_seq_len)
    tt2 = jax.random.normal(jax.random.PRNGKey(1), (B, N, D2), dtype=jnp.float32)
    out2 = jax.block_until_ready(vision_rotary_embedding_fast(tt2, cos2, sin2))
    ref2 = _rope_ref(tt2, cos2, sin2)
    np.testing.assert_allclose(np.asarray(out2), np.asarray(ref2), rtol=1e-5, atol=1e-5)

    print("KERNEL_OK")
</pallas_src>

<mosaic_0001>
module attributes {stable_mosaic.version = 11 : i64} {
  func.func @_rope_kernel(%arg0: i32, %arg1: i32, %arg2: memref<1x16x128xf32, #tpu.memory_space<vmem>>, %arg3: memref<3x16x128xf32, #tpu.memory_space<vmem>>, %arg4: memref<1x16x128xf32, #tpu.memory_space<vmem>>) attributes {dimension_semantics = [#tpu.dimension_semantics<arbitrary>, #tpu.dimension_semantics<parallel>], iteration_bounds = array<i64: 1, 2>, scalar_prefetch = 0 : i64, scratch_operands = 0 : i64, tpu.core_type = #tpu.core_type<tc>, window_params = [{transform_indices = @transform_0, window_bounds = array<i64: 1, 16, 128>}, {transform_indices = @transform_1, window_bounds = array<i64: 3, 16, 128>}, {transform_indices = @transform_2, window_bounds = array<i64: 1, 16, 128>}]} {
    %c0 = arith.constant 0 : index
    %c0_0 = arith.constant 0 : index
    %c0_1 = arith.constant 0 : index
    %0 = vector.load %arg2[%c0, %c0_0, %c0_1] : memref<1x16x128xf32, #tpu.memory_space<vmem>>, vector<1x16x128xf32>
    %c127_i32 = arith.constant 127 : i32
    %1 = tpu.dynamic_rotate %0 by %c127_i32 dim 2 : vector<1x16x128xf32>, i32 -> vector<1x16x128xf32>
    %c1_i32 = arith.constant 1 : i32
    %2 = tpu.dynamic_rotate %0 by %c1_i32 dim 2 : vector<1x16x128xf32>, i32 -> vector<1x16x128xf32>
    %c0_2 = arith.constant 0 : index
    %c0_3 = arith.constant 0 : index
    %c0_4 = arith.constant 0 : index
    %3 = vector.load %arg3[%c0_2, %c0_3, %c0_4] : memref<3x16x128xf32, #tpu.memory_space<vmem>>, vector<1x16x128xf32>
    %4 = vector.shape_cast %3 : vector<1x16x128xf32> to vector<16x128xf32>
    %c1 = arith.constant 1 : index
    %c0_5 = arith.constant 0 : index
    %c0_6 = arith.constant 0 : index
    %5 = vector.load %arg3[%c1, %c0_5, %c0_6] : memref<3x16x128xf32, #tpu.memory_space<vmem>>, vector<1x16x128xf32>
    %6 = vector.shape_cast %5 : vector<1x16x128xf32> to vector<16x128xf32>
    %c2 = arith.constant 2 : index
    %c0_7 = arith.constant 0 : index
    %c0_8 = arith.constant 0 : index
    %7 = vector.load %arg3[%c2, %c0_7, %c0_8] : memref<3x16x128xf32, #tpu.memory_space<vmem>>, vector<1x16x128xf32>
    %8 = vector.shape_cast %7 : vector<1x16x128xf32> to vector<16x128xf32>
    %9 = vector.shape_cast %4 : vector<16x128xf32> to vector<1x16x128xf32>
    %10 = arith.mulf %0, %9 : vector<1x16x128xf32>
    %11 = vector.shape_cast %6 : vector<16x128xf32> to vector<1x16x128xf32>
    %12 = arith.mulf %1, %11 : vector<1x16x128xf32>
    %13 = arith.addf %10, %12 : vector<1x16x128xf32>
    %14 = vector.shape_cast %8 : vector<16x128xf32> to vector<1x16x128xf32>
    %15 = arith.mulf %2, %14 : vector<1x16x128xf32>
    %16 = arith.addf %13, %15 : vector<1x16x128xf32>
    %c0_9 = arith.constant 0 : index
    %c0_10 = arith.constant 0 : index
    %c0_11 = arith.constant 0 : index
    %17 = vector.load %arg4[%c0_9, %c0_10, %c0_11] : memref<1x16x128xf32, #tpu.memory_space<vmem>>, vector<1x16x128xf32>
    tpu.vector_store %arg4[%c0_9, %c0_10, %c0_11], %16 {strides = array<i32>} : memref<1x16x128xf32, #tpu.memory_space<vmem>>, vector<1x16x128xf32>,
    return
  }
  func.func @transform_0(%arg0: i32, %arg1: i32) -> (i32, i32, i32) {
    %c0_i32 = arith.constant 0 : i32
    %c0_i32_0 = arith.constant 0 : i32
    return %arg1, %arg0, %c0_i32 : i32, i32, i32
  }
  func.func @transform_1(%arg0: i32, %arg1: i32) -> (i32, i32, i32) {
    %c0_i32 = arith.constant 0 : i32
    %c0_i32_0 = arith.constant 0 : i32
    %c0_i32_1 = arith.constant 0 : i32
    return %c0_i32, %arg0, %c0_i32_0 : i32, i32, i32
  }
  func.func @transform_2(%arg0: i32, %arg1: i32) -> (i32, i32, i32) {
    %c0_i32 = arith.constant 0 : i32
    %c0_i32_0 = arith.constant 0 : i32
    return %arg1, %arg0, %c0_i32 : i32, i32, i32
  }
}

</mosaic_0001>

<bundles_post_ra>
// kernel: tpu_custom_call.1
= control target key start
LH: loop header
LB: loop body
LE: loop exit
PB: predicated region body
PF: predicated region fallthrough
CT: control target
= control target key end

     0   :  { %7 = vsyncpa [#allocation3], 0  ;;  %s800_s0 = inlined_call_operand.hbm [shape: f32[2,16,128], index: 0, kind: input, shape index: {}]   ;;  %s801_s1 = inlined_call_operand.hbm [shape: f32[3,16,128], index: 1, kind: input, shape index: {}]   ;;  %s802_s2 = inlined_call_operand.hbm [shape: f32[2,16,128], index: 2, kind: output, shape index: {}]  }
   0x1   :  { %9 = vsyncpa [#allocation3 + $0x1], 0 }
   0x2   :  { %10 = vsyncpa [#allocation6], 0 }
   0x3   :  { %11 = vsyncpa [#allocation4], 0 }
   0x4   :  { %13 = vsyncpa [#allocation4 + $0x1], 0  ;;  %s613_s9 = smov 0   ;;  %s615_s10 = smov 0  }
   0x5   :  { %s617_s11 = smov 0   ;;  %s619_s12 = smov 0  }
   0x6   :  { %s621_s13 = smov 0   ;;  %s623_s14 = smov 0  }
   0x7 LB: > { %s351_s15 = sadd.s32 4294967295, %s587_s14   ;;  %s352_s16 = sadd.s32 4294967294, %s587_s14   ;;  %s587_s14 = sphi %s623_s14, %s19_s14   ;;  %s583_s13 = sphi %s621_s13, %s822_s13   ;;  %s579_s12 = sphi %s619_s12, %s821_s12   ;;  %s575_s11 = sphi %s617_s11, %s820_s11   ;;  %s571_s10 = sphi %s615_s10, %s819_s10   ;;  %s567_s9 = sphi %s613_s9, %s818_s9  }
   0x8   : > { %p53_p0 = scmp.ne.s32.totalorder %s571_s10, %s567_s9  ;;  %p647_p1 = scmp.eq.s32.totalorder %s351_s15, 0 }
   0x9   : > { %p651_p2 = scmp.eq.s32.totalorder %s351_s15, 1  ;;  %p111_p3 = scmp.eq.s32.totalorder %s352_s16, 1 }
   0xa   : > { %p657_p4 = por %p647_p1, %p53_p0  ;;  %p353_p5 = scmp.ge.s32.totalorder %s587_s14, 1 }
   0xb   : > { %p662_p6 = por %p111_p3, %p53_p0  ;;  %p118_p7 = scmp.lt.s32.totalorder %s587_s14, 3 }
   0xc   : > { %s807_s19 = scalar_select %p657_p4, 1, 0 }
   0xd   : > { %s808_s20 = scalar_select %p662_p6, 1, 0 }
   0xe   : > { %p667_p8 = pnand %p353_p5, %p118_p7  ;;  %s589_s22 = smov [#allocation5]  }
   0xf   : > { %s133_s23 = sshll.u32 %s589_s22, 4  ;;  %s28_s25 = sadd.s32 1, %s583_s13  ;;  %s134_s23 = int_to_ptr.vmem [resolvable:$true] %s133_s23 }
  0x10   : > { %p378_p9 = pneg %p667_p8  ;;  %s460_s26 = scalar_lea.vmem %s134_s23, 768 }
  0x11   : > { %p461_p13 = scmp.ne.s32.totalorder %s134_s23, %s460_s26  ;;  %p468_p5 = scmp.lt.s32.totalorder %s134_s23, %s134_s23 }
  0x12   : > { %p676_p11 = pnand %p378_p9, %p647_p1  ;;  %p469_p7 = scmp.lt.s32.totalorder %s460_s26, %s460_s26 }
  0x14   : > { %p451_p12 = pneg %p676_p11  ;;  %p470_p6 = por %p469_p7, %p468_p5 }
  0x16   : > { %p463_p0 = pnand %p461_p13, %p451_p12 }
  0x18   : > { %p464_p3 = pneg %p463_p0 }
  0x1a   : > { %p471_p4 = pnand %p470_p6, %p464_p3 }
  0x1c   : > { %474 = shalt.err (!%p471_p4)
}
  0x1d   : > { %s804_s27 = smov 128   ;;  %s591_s28 = smov 8  }
  0x1e   : > { %381 = dma.hbm_to_vmem [thread:$0]  (!%p676_p11), %s801_s1, 768, %s134_s23, [#allocation6], %s804_s27, %s804_s27, %s591_s28  }
  0x1f   : > { %p29_p4 = scmp.ge.s32.totalorder %s28_s25, 2  ;;  %s40_s3 = sadd.s32 1, %s575_s11 }
  0x20   : > { %p47_p6 = scmp.ne.s32.totalorder %s575_s11, %s571_s10  ;;  %p48_p9 = scmp.eq.s32.totalorder %s587_s14, 0 }
  0x21   : > { %s824_s25 = smov (%p29_p4, %s28_s25), 0  ;;  %p391_p0 = scmp.lt.s32.totalorder %s587_s14, 2 }
  0x22   : > { %p697_p12 = por %p48_p9, %p47_p6  ;;  %p703_p13 = por %p651_p2, %p47_p6 }
  0x23   : > { %s35_s6 = ssub.s32 %s583_s13, %s824_s25  ;;  %s147_s7 = sand.u32 1, %s575_s11  }
  0x24   : > { %p38_p11 = scmp.eq.s32.totalorder %s35_s6, 0  ;;  %s356_s8 = sshll.u32 %s147_s7, 4 }
  0x25   : > { %s368_s16 = sshll.u32 %s583_s13, 8  ;;  %s151_s26 = scalar_lea.vmem [#allocation2], %s356_s8 }
  0x26   : > { %s712_s15 = scalar_select %p38_p11, %s575_s11, %s40_s3  }
  0x27   : > { %s159_s24 = scalar_lea.hbm %s800_s0, %s368_s16  ;;  %s160_s29 = sshll.u32 %s151_s26, 4  ;;  %s161_s29 = int_to_ptr.vmem [resolvable:$true] %s160_s29 }
  0x28   : > { %p720_p2 = pnand %p391_p0, %p697_p12  ;;  %s148_s30 = scalar_lea.sflag [#allocation3], %s147_s7 }
  0x29   : > { %s488_s6 = scalar_lea.vmem %s161_s29, 256  ;;  %s592_s3 = smov [#allocation2]  }
  0x2a   : > { %p477_p3 = pneg %p720_p2  ;;  %p489_p5 = scmp.ne.s32.totalorder %s161_s29, %s488_s6 }
  0x2b   : > { %s493_s27 = sshll.u32 %s592_s3, 4  ;;  %s494_s27 = int_to_ptr.vmem [resolvable:$false] %s493_s27 }
  0x2c   : > { %p491_p7 = pnand %p489_p5, %p477_p3  ;;  %s495_s16 = scalar_lea.vmem %s494_s27, 512 }
  0x2d   : > { %p496_p6 = scmp.lt.s32.totalorder %s161_s29, %s494_s27  ;;  %p497_p9 = scmp.lt.s32.totalorder %s495_s16, %s488_s6 }
  0x2e   : > { %p492_p4 = pneg %p491_p7 }
  0x2f   : > { %p498_p11 = por %p497_p9, %p496_p6 }
  0x31   : > { %p499_p10 = pnand %p498_p11, %p492_p4 }
  0x33   : > { %502 = shalt.err (!%p499_p10)
}
  0x34   : > { %s814_s4 = smov 128   ;;  %172 = sbr.rel (%p667_p8) target bundleno = 200 (0xc8), region = 28 }
  0x35   : > { %385 = dma.hbm_to_vmem [thread:$0]  (!%p720_p2), %s159_s24, 256, %s161_s29, %s148_s30, %s814_s4, %s814_s4, %s591_s28  }
  0x36   : > { %s734_s7 = sand.u32 (!%p667_p8), 1, %s571_s10   ;;  %p815_p12 = scmp.ne.s32.totalorder (!%p667_p8), %s807_s19, 0 }
  0x37   : > { %s360_s27 = sshll.u32 (!%p667_p8), %s734_s7, 4  ;;  %s175_s8 = scalar_lea.sflag (!%p667_p8), [#allocation3], %s734_s7 }
  0x38   : > { %s178_s22 = scalar_lea.vmem (!%p667_p8), [#allocation2], %s360_s27 }
  0x39   : > { %554 = dma.done.wait (%p815_p12), %s175_s8, 256  }
  0x3a   : > { %556 = vsyncadd (%p815_p12), %s175_s8, 4294967040 }
  0x3b   : > { %558 = dma.done.wait (%p647_p1), [#allocation6], 768  }
  0x3c   : > { %560 = vsyncadd (%p647_p1), [#allocation6], 4294966528  ;;  %v206_v0 = vld [vmem:[%s178_s22] sm:$0xff]  ;;  %s593_s21 = smov 127   ;;  %s594_s28 = smov 1   ;;  %v207_v1 = vld [vmem:[%s178_s22 + $0x8] sm:$0xff] }
  0x3d   : > { %208 = vrot.lane.b32.xlu0 %v206_v0, %s593_s21  ;;  %212 = vrot.lane.b32.xlu1 %v206_v0, %s594_s28  ;;  %v216_v2 = vld [vmem:[#allocation5] sm:$0xff]  ;;  %v219_v3 = vld [vmem:[#allocation5 + $0x10] sm:$0xff]  ;;  %v217_v6 = vld [vmem:[#allocation5 + $0x8] sm:$0xff]  ;;  %s202_s17 = scalar_lea.vmem [#allocation7], %s360_s27  ;;  %s369_s23 = sshll.u32 %s579_s12, 8 }
  0x3e   : > { %v222_v4 = vld [vmem:[#allocation5 + $0x20] sm:$0xff]  ;;  %v224_v5 = vmul.f32 %v216_v2, %v206_v0  ;;  %v220_v11 = vld [vmem:[#allocation5 + $0x18] sm:$0xff]  ;;  %v223_v12 = vld [vmem:[#allocation5 + $0x28] sm:$0xff]  ;;  %v225_v13 = vmul.f32 %v217_v6, %v207_v1  ;;  %s252_s19 = sshll.u32 %s202_s17, 4  ;;  %s752_s29 = scalar_lea.hbm %s802_s2, %s369_s23  ;;  %s747_s19 = int_to_ptr.vmem [resolvable:$true] %s252_s19 }
  0x3f   : > { %s237_s18 = scalar_lea.sflag [#allocation4], %s734_s7  ;;  %s503_s30 = scalar_lea.vmem %s747_s19, 256 }
  0x40   : > { %p504_p1 = scmp.ne.s32.totalorder %s747_s19, %s503_s30  ;;  %s595_s12 = smov [#allocation7]  }
  0x41   : > { %210 = vrot.lane.b32.xlu0 %v207_v1, %s593_s21  ;;  %214 = vrot.lane.b32.xlu1 %v207_v1, %s594_s28  ;;  %s507_s6 = sshll.u32 %s595_s12, 4  ;;  %s508_s6 = int_to_ptr.vmem [resolvable:$false] %s507_s6 }
  0x42   : > { %p505_p8 = pnand %p504_p1, %p703_p13  ;;  %s509_s3 = scalar_lea.vmem %s508_s6, 512 }
  0x43   : > { %p510_p0 = scmp.lt.s32.totalorder %s747_s19, %s508_s6  ;;  %p511_p2 = scmp.lt.s32.totalorder %s509_s3, %s503_s30 }
  0x44   : > { %p506_p10 = pneg %p505_p8 }
  0x45   : > { %p512_p3 = por %p511_p2, %p510_p0 }
  0x47   : > { %p513_p5 = pnand %p512_p3, %p506_p10 }
  0xaf   : > { %v209_v7 = vpop.permute.xlu0 %208  ;;  %v213_v8 = vpop.permute.xlu1 %212 }
  0xb0   : > { %v226_v9 = vmul.f32 %v219_v3, %v209_v7  ;;  %v230_v10 = vmul.f32 %v222_v4, %v213_v8 }
  0xb2   : > { %v228_v14 = vadd.f32 %v226_v9, %v224_v5 }
  0xb3   : > { %v211_v15 = vpop.permute.xlu0 %210  ;;  %v215_v16 = vpop.permute.xlu1 %214 }
  0xb4   : > { %v232_v17 = vadd.f32 %v230_v10, %v228_v14  ;;  %v227_v18 = vmul.f32 %v220_v11, %v211_v15  ;;  %v231_v19 = vmul.f32 %v223_v12, %v215_v16 }
  0xb6   : > { %234 = vst [vmem:[%s202_s17] sm:$0xff] %v232_v17  ;;  %v229_v20 = vadd.f32 %v227_v18, %v225_v13 }
  0xb8   : > { %v233_v21 = vadd.f32 %v231_v19, %v229_v20 }
  0xba   : > { %235 = vst [vmem:[%s202_s17 + $0x8] sm:$0xff] %v233_v21 }
  0xbb   : > { %516 = shalt.err (!%p513_p5)
}
  0xbc   : > { %s517_s16 = scalar_lea.hbm %s752_s29, 256  ;;  %s521_s8 = scalar_lea.hbm %s802_s2, 512 }
  0xbd   : > { %p518_p7 = scmp.ne.s32.totalorder %s752_s29, %s517_s16  ;;  %p522_p9 = scmp.lt.s32.totalorder %s752_s29, %s802_s2 }
  0xbe   : > { %p523_p11 = scmp.lt.s32.totalorder %s521_s8, %s517_s16 }
  0xbf   : > { %p519_p4 = pnand %p518_p7, %p703_p13 }
  0xc0   : > { %p524_p12 = por %p523_p11, %p522_p9 }
  0xc1   : > { %p520_p6 = pneg %p519_p4 }
  0xc3   : > { %p525_p1 = pnand %p524_p12, %p520_p6 }
  0xc5   : > { %528 = shalt.err (!%p525_p1)
}
  0xc6   : > { %s596_s28 = smov 128   ;;  %s597_s17 = smov 8  }
  0xc7   : > { %376 = dma.vmem_to_hbm [thread:$0]  (%p703_p13), %s747_s19, 256, %s752_s29, %s237_s18, %s596_s28, %s596_s28, %s597_s17  }
  0xc8 PF: > { %s267_s23 = sand.u32 1, %s567_s9   ;;  %p816_p8 = scmp.ne.s32.totalorder %s808_s20, 0 }
  0xc9   : > { %p817_p10 = scmp.ge.s32.totalorder %s587_s14, 2  ;;  %s268_s24 = scalar_lea.sflag [#allocation4], %s267_s23 }
  0xcb   : > { %p387_p0 = pnand %p817_p10, %p816_p8 }
  0xcd   : > { %p388_p2 = pneg %p387_p0 }
  0xcf   : > { %562 = dma.done.wait (%p388_p2), %s268_s24, 256  }
  0xd0   : > { %564 = vsyncadd (%p388_p2), %s268_s24, 4294967040  ;;  %s19_s14 = sadd.s32 1, %s587_s14   ;;  %s818_s9 = smov %s571_s10 }
  0xd1   : > { %p16_p3 = scmp.ge.s32.totalorder %s19_s14, 4   ;;  %s819_s10 = smov %s575_s11 }
  0xd2   : > { %s820_s11 = smov %s712_s15  ;;  %s821_s12 = smov %s583_s13 }
  0xd3   : > { %s822_s13 = smov %s824_s25  ;;  %18 = sbr.rel (!%p16_p3) target bundleno = 7 (0x7), region = 80 }
  0xd8   :  { %273 = vsyncpa [#allocation3], 1 }
  0xd9   :  { %275 = vsyncpa [#allocation3 + $0x1], 1 }
  0xda   :  { %276 = vsyncpa [#allocation6], 1 }
  0xdb   :  { %277 = vsyncpa [#allocation4], 1 }
  0xdc   :  { %279 = vsyncpa [#allocation4 + $0x1], 1 }

</bundles_post_ra>
